<compile_context>
chip_gen: v6e
topology: v6e:2x2x1
jax: 0.10.0
libtpu: 0.0.40
codegen_flags: <defaults>
</compile_context>

<pallas_src>
import functools

import jax
import jax.numpy as jnp
from jax.experimental import pallas as pl
from jax.experimental.pallas import tpu as pltpu


def _depth_to_space_kernel(x_ref, s_ref, o_ref, *, bs):
    # x_ref: (1, bs*bs, cp_t, H, W)   channels grouped as (b1*bs + b2, c')
    # s_ref: (bs, W, W*bs)            one-hot lane scatter: s[b2, w, w*bs + b2] == 1
    # o_ref: (1, cp_t, H*bs, W*bs)    final NCHW-layout output block
    _, _, cp_t, H, W = x_ref.shape
    _, _, Hb, Wb = o_ref.shape

    rows = []
    for b1 in range(bs):                                   # static unroll (bs is small)
        acc = None
        for b2 in range(bs):
            xb = x_ref[0, b1 * bs + b2]                    # (cp_t, H, W), input dtype
            if xb.dtype != s_ref.dtype:
                xb = xb.astype(s_ref.dtype)                # only for odd float dtypes
            x2d = xb.reshape(cp_t * H, W)                  # fold c', h into the MXU M dim
            term = jnp.dot(x2d, s_ref[b2],                 # lane scatter  w -> w*bs + b2
                           preferred_element_type=jnp.float32)
            acc = term if acc is None else acc + term      # disjoint columns -> exact
        rows.append(acc.reshape(cp_t, H, Wb).astype(o_ref.dtype))

    # Row interleave  h -> h*bs + b1 : sublane-side stack + reshape (no matmul,
    # lane dim untouched), then one dense store of the whole output block.
    y = jnp.stack(rows, axis=2)                            # (cp_t, H, bs, Wb)
    o_ref[0] = y.reshape(cp_t, Hb, Wb)


def depth_to_space(x, block_size, *, cp_tile_bytes=4 << 20):
    """Pallas TPU equivalent of DepthToSpace.forward (NCHW in, NCHW out)."""
    N, C, H, W = x.shape
    bs = int(block_size)
    assert bs >= 1 and C % (bs * bs) == 0, (C, bs)
    Cp = C // (bs * bs)
    Hb, Wb = H * bs, W * bs

    # Free metadata reshape: channel -> (b1*bs + b2, c')  (DCR, matches the module).
    x5 = x.reshape(N, bs * bs, Cp, H, W)

    # One-hot (0/1) scatter weights are exact in bf16 and f32; other float dtypes
    # are promoted to f32 inside the kernel.
    if x.dtype == jnp.bfloat16 or x.dtype == jnp.float32:
        s_dtype = x.dtype
    else:
        s_dtype = jnp.float32
    # TODO(synk): integer inputs would need a bitcast / strided-store path (v7x MXU has no int).

    # Hoisted one-hot lane-scatter matrices: S[b2, w, q] = 1 iff q == w*bs + b2.
    w_idx = jnp.arange(W, dtype=jnp.int32)[None, :, None]
    q_idx = jnp.arange(Wb, dtype=jnp.int32)[None, None, :]
    b2_idx = jnp.arange(bs, dtype=jnp.int32)[:, None, None]
    S = (q_idx == w_idx * bs + b2_idx).astype(s_dtype)      # (bs, W, Wb)

    # Channel tiling: keep input/output tiles (equal byte size) small enough that
    # double-buffered tiles + in-kernel temporaries fit scoped VMEM on all chips.
    per_cp_bytes = bs * bs * H * W * x.dtype.itemsize
    cap = max(1, cp_tile_bytes // max(per_cp_bytes, 1))
    cp_t = 1
    for d in range(1, Cp + 1):                               # largest divisor <= cap
        if Cp % d == 0 and d <= cap:
            cp_t = d

    kernel = functools.partial(_depth_to_space_kernel, bs=bs)
    return pl.pallas_call(
        kernel,
        out_shape=jax.ShapeDtypeStruct((N, Cp, Hb, Wb), x.dtype),
        grid=(N, Cp // cp_t),
        in_specs=[
            pl.BlockSpec((1, bs * bs, cp_t, H, W), lambda n, cp: (n, 0, cp, 0, 0)),
            pl.BlockSpec((bs, W, Wb), lambda n, cp: (0, 0, 0)),   # constant block: DMA'd once
        ],
        out_specs=pl.BlockSpec((1, cp_t, Hb, Wb), lambda n, cp: (n, cp, 0, 0)),
        compiler_params=pltpu.CompilerParams(
            dimension_semantics=("parallel", "parallel")),
    )(x5, S)


def _reference_depth_to_space(x, bs):
    """Pure-JAX mirror of the PyTorch module (view -> permute -> view)."""
    N, C, H, W = x.shape
    Cp = C // (bs * bs)
    y = x.reshape(N, bs, bs, Cp, H, W)
    y = jnp.transpose(y, (0, 3, 4, 1, 5, 2))
    return y.reshape(N, Cp, H * bs, W * bs)


if __name__ == "__main__":
    # DepthToSpace(block_size=2) on x: (N=2, C=16, H=16, W=16) -> (2, 4, 32, 32)
    N, C, H, W, bs = 2, 16, 16, 16, 2

    key = jax.random.PRNGKey(0)
    # Integer-valued float32 data: exactly representable on every MXU precision
    # path, so the permutation result is bit-exact.
    x = jax.random.randint(key, (N, C, H, W), 0, 256).astype(jnp.float32)

    out = jax.block_until_ready(depth_to_space(x, bs))
    ref = _reference_depth_to_space(x, bs)

    assert out.shape == (N, C // (bs * bs), H * bs, W * bs), out.shape
    assert out.dtype == x.dtype
    assert jnp.allclose(out, ref, atol=1e-4, rtol=0.0), float(jnp.max(jnp.abs(out - ref)))

    print("KERNEL_OK")
</pallas_src>

<mosaic_0001>
module attributes {stable_mosaic.version = 11 : i64} {
  func.func @_depth_to_space_kernel(%arg0: i32, %arg1: i32, %arg2: memref<1x4x4x16x16xf32, #tpu.memory_space<vmem>>, %arg3: memref<2x16x32xf32, #tpu.memory_space<vmem>>, %arg4: memref<1x4x32x32xf32, #tpu.memory_space<vmem>>) attributes {dimension_semantics = [#tpu.dimension_semantics<parallel>, #tpu.dimension_semantics<parallel>], iteration_bounds = array<i64: 2, 1>, scalar_prefetch = 0 : i64, scratch_operands = 0 : i64, tpu.core_type = #tpu.core_type<tc>, window_params = [{transform_indices = @transform_0, window_bounds = array<i64: 1, 4, 4, 16, 16>}, {pipeline_mode = #tpu.pipeline_mode<synchronous>, transform_indices = @transform_1, window_bounds = array<i64: 2, 16, 32>}, {transform_indices = @transform_2, window_bounds = array<i64: 1, 4, 32, 32>}]} {
    %c0 = arith.constant 0 : index
    %c0_0 = arith.constant 0 : index
    %c0_1 = arith.constant 0 : index
    %c0_2 = arith.constant 0 : index
    %c0_3 = arith.constant 0 : index
    %0 = vector.load %arg2[%c0, %c0_0, %c0_1, %c0_2, %c0_3] : memref<1x4x4x16x16xf32, #tpu.memory_space<vmem>>, vector<1x1x4x16x16xf32>
    %1 = vector.shape_cast %0 : vector<1x1x4x16x16xf32> to vector<4x16x16xf32>
    %2 = vector.shape_cast %1 : vector<4x16x16xf32> to vector<64x16xf32>
    %c0_4 = arith.constant 0 : index
    %c0_5 = arith.constant 0 : index
    %c0_6 = arith.constant 0 : index
    %3 = vector.load %arg3[%c0_4, %c0_5, %c0_6] : memref<2x16x32xf32, #tpu.memory_space<vmem>>, vector<1x16x32xf32>
    %4 = vector.shape_cast %3 : vector<1x16x32xf32> to vector<16x32xf32>
    %cst = arith.constant dense<0.000000e+00> : vector<64x32xf32>
    %5 = tpu.matmul %2, %4, %cst {dimension_numbers = #tpu.dot_dimension_numbers<[1], [0], [0], [1], [0, 0, 1, 1], [], []>} : vector<64x16xf32>, vector<16x32xf32>, vector<64x32xf32> -> vector<64x32xf32>
    %c0_7 = arith.constant 0 : index
    %c1 = arith.constant 1 : index
    %c0_8 = arith.constant 0 : index
    %c0_9 = arith.constant 0 : index
    %c0_10 = arith.constant 0 : index
    %6 = vector.load %arg2[%c0_7, %c1, %c0_8, %c0_9, %c0_10] : memref<1x4x4x16x16xf32, #tpu.memory_space<vmem>>, vector<1x1x4x16x16xf32>
    %7 = vector.shape_cast %6 : vector<1x1x4x16x16xf32> to vector<4x16x16xf32>
    %8 = vector.shape_cast %7 : vector<4x16x16xf32> to vector<64x16xf32>
    %c1_11 = arith.constant 1 : index
    %c0_12 = arith.constant 0 : index
    %c0_13 = arith.constant 0 : index
    %9 = vector.load %arg3[%c1_11, %c0_12, %c0_13] : memref<2x16x32xf32, #tpu.memory_space<vmem>>, vector<1x16x32xf32>
    %10 = vector.shape_cast %9 : vector<1x16x32xf32> to vector<16x32xf32>
    %cst_14 = arith.constant dense<0.000000e+00> : vector<64x32xf32>
    %11 = tpu.matmul %8, %10, %cst_14 {dimension_numbers = #tpu.dot_dimension_numbers<[1], [0], [0], [1], [0, 0, 1, 1], [], []>} : vector<64x16xf32>, vector<16x32xf32>, vector<64x32xf32> -> vector<64x32xf32>
    %12 = arith.addf %5, %11 : vector<64x32xf32>
    %13 = vector.shape_cast %12 : vector<64x32xf32> to vector<4x16x32xf32>
    %c0_15 = arith.constant 0 : index
    %c2 = arith.constant 2 : index
    %c0_16 = arith.constant 0 : index
    %c0_17 = arith.constant 0 : index
    %c0_18 = arith.constant 0 : index
    %14 = vector.load %arg2[%c0_15, %c2, %c0_16, %c0_17, %c0_18] : memref<1x4x4x16x16xf32, #tpu.memory_space<vmem>>, vector<1x1x4x16x16xf32>
    %15 = vector.shape_cast %14 : vector<1x1x4x16x16xf32> to vector<4x16x16xf32>
    %16 = vector.shape_cast %15 : vector<4x16x16xf32> to vector<64x16xf32>
    %c0_19 = arith.constant 0 : index
    %c0_20 = arith.constant 0 : index
    %c0_21 = arith.constant 0 : index
    %17 = vector.load %arg3[%c0_19, %c0_20, %c0_21] : memref<2x16x32xf32, #tpu.memory_space<vmem>>, vector<1x16x32xf32>
    %18 = vector.shape_cast %17 : vector<1x16x32xf32> to vector<16x32xf32>
    %cst_22 = arith.constant dense<0.000000e+00> : vector<64x32xf32>
    %19 = tpu.matmul %16, %18, %cst_22 {dimension_numbers = #tpu.dot_dimension_numbers<[1], [0], [0], [1], [0, 0, 1, 1], [], []>} : vector<64x16xf32>, vector<16x32xf32>, vector<64x32xf32> -> vector<64x32xf32>
    %c0_23 = arith.constant 0 : index
    %c3 = arith.constant 3 : index
    %c0_24 = arith.constant 0 : index
    %c0_25 = arith.constant 0 : index
    %c0_26 = arith.constant 0 : index
    %20 = vector.load %arg2[%c0_23, %c3, %c0_24, %c0_25, %c0_26] : memref<1x4x4x16x16xf32, #tpu.memory_space<vmem>>, vector<1x1x4x16x16xf32>
    %21 = vector.shape_cast %20 : vector<1x1x4x16x16xf32> to vector<4x16x16xf32>
    %22 = vector.shape_cast %21 : vector<4x16x16xf32> to vector<64x16xf32>
    %c1_27 = arith.constant 1 : index
    %c0_28 = arith.constant 0 : index
    %c0_29 = arith.constant 0 : index
    %23 = vector.load %arg3[%c1_27, %c0_28, %c0_29] : memref<2x16x32xf32, #tpu.memory_space<vmem>>, vector<1x16x32xf32>
    %24 = vector.shape_cast %23 : vector<1x16x32xf32> to vector<16x32xf32>
    %cst_30 = arith.constant dense<0.000000e+00> : vector<64x32xf32>
    %25 = tpu.matmul %22, %24, %cst_30 {dimension_numbers = #tpu.dot_dimension_numbers<[1], [0], [0], [1], [0, 0, 1, 1], [], []>} : vector<64x16xf32>, vector<16x32xf32>, vector<64x32xf32> -> vector<64x32xf32>
    %26 = arith.addf %19, %25 : vector<64x32xf32>
    %27 = vector.shape_cast %26 : vector<64x32xf32> to vector<4x16x32xf32>
    %28 = vector.shape_cast %13 : vector<4x16x32xf32> to vector<4x16x1x32xf32>
    %29 = vector.shape_cast %27 : vector<4x16x32xf32> to vector<4x16x1x32xf32>
    %30 = tpu.concatenate %28, %29 in 2 : vector<4x16x1x32xf32>, vector<4x16x1x32xf32> -> vector<4x16x2x32xf32>
    %31 = vector.shape_cast %30 : vector<4x16x2x32xf32> to vector<4x32x32xf32>
    %c0_31 = arith.constant 0 : index
    %c0_32 = arith.constant 0 : index
    %c0_33 = arith.constant 0 : index
    %c0_34 = arith.constant 0 : index
    %32 = vector.load %arg4[%c0_31, %c0_32, %c0_33, %c0_34] : memref<1x4x32x32xf32, #tpu.memory_space<vmem>>, vector<1x4x32x32xf32>
    %33 = vector.shape_cast %32 : vector<1x4x32x32xf32> to vector<4x32x32xf32>
    %34 = vector.shape_cast %31 : vector<4x32x32xf32> to vector<1x4x32x32xf32>
    tpu.vector_store %arg4[%c0_31, %c0_32, %c0_33, %c0_34], %34 {strides = array<i32>} : memref<1x4x32x32xf32, #tpu.memory_space<vmem>>, vector<1x4x32x32xf32>,
    return
  }
  func.func @transform_0(%arg0: i32, %arg1: i32) -> (i32, i32, i32, i32, i32) {
    %c0_i32 = arith.constant 0 : i32
    %c0_i32_0 = arith.constant 0 : i32
    %c0_i32_1 = arith.constant 0 : i32
    %c0_i32_2 = arith.constant 0 : i32
    return %arg0, %c0_i32, %arg1, %c0_i32_0, %c0_i32_1 : i32, i32, i32, i32, i32
  }
  func.func @transform_1(%arg0: i32, %arg1: i32) -> (i32, i32, i32) {
    %c0_i32 = arith.constant 0 : i32
    %c0_i32_0 = arith.constant 0 : i32
    %c0_i32_1 = arith.constant 0 : i32
    %c0_i32_2 = arith.constant 0 : i32
    return %c0_i32, %c0_i32_0, %c0_i32_1 : i32, i32, i32
  }
  func.func @transform_2(%arg0: i32, %arg1: i32) -> (i32, i32, i32, i32) {
    %c0_i32 = arith.constant 0 : i32
    %c0_i32_0 = arith.constant 0 : i32
    %c0_i32_1 = arith.constant 0 : i32
    return %arg0, %arg1, %c0_i32, %c0_i32_0 : i32, i32, i32, i32
  }
}

</mosaic_0001>

<bundles_post_ra>
// kernel: tpu_custom_call.1
= control target key start
LH: loop header
LB: loop body
LE: loop exit
PB: predicated region body
PF: predicated region fallthrough
CT: control target
= control target key end

     0   :  { %7 = vsyncpa [#allocation3], 0  ;;  %s3707_s0 = inlined_call_operand.hbm [shape: f32[2,4,4,16,16], index: 0, kind: input, shape index: {}]   ;;  %s3708_s1 = inlined_call_operand.hbm [shape: f32[2,16,32], index: 1, kind: input, shape index: {}]   ;;  %s3709_s2 = inlined_call_operand.hbm [shape: f32[2,4,32,32], index: 2, kind: output, shape index: {}]  }
   0x1   :  { %9 = vsyncpa [#allocation3 + $0x1], 0 }
   0x2   :  { %10 = vsyncpa [#allocation6], 0 }
   0x3   :  { %11 = vsyncpa [#allocation4], 0 }
   0x4   :  { %13 = vsyncpa [#allocation4 + $0x1], 0  ;;  %s2909_s9 = smov 0   ;;  %s2911_s10 = smov 0  }
   0x5   :  { %s2913_s11 = smov 0   ;;  %s2915_s12 = smov 0  }
   0x6   :  { %s2917_s13 = smov 0   ;;  %s2919_s14 = smov 0  }
   0x7 LB: > { %s2487_s15 = sadd.s32 4294967295, %s2883_s14   ;;  %s2488_s16 = sadd.s32 4294967294, %s2883_s14   ;;  %s2883_s14 = sphi %s2919_s14, %s19_s14   ;;  %s2879_s13 = sphi %s2917_s13, %s3745_s13   ;;  %s2875_s12 = sphi %s2915_s12, %s3744_s12   ;;  %s2871_s11 = sphi %s2913_s11, %s3743_s11   ;;  %s2867_s10 = sphi %s2911_s10, %s3742_s10   ;;  %s2863_s9 = sphi %s2909_s9, %s3741_s9  }
   0x8   : > { %p53_p0 = scmp.ne.s32.totalorder %s2867_s10, %s2863_s9  ;;  %p2943_p1 = scmp.eq.s32.totalorder %s2487_s15, 0 }
   0x9   : > { %p2947_p2 = scmp.eq.s32.totalorder %s2487_s15, 1  ;;  %p106_p3 = scmp.eq.s32.totalorder %s2488_s16, 1 }
   0xa   : > { %p2953_p4 = por %p2943_p1, %p53_p0  ;;  %p2489_p5 = scmp.ge.s32.totalorder %s2883_s14, 1 }
   0xb   : > { %p2958_p6 = por %p106_p3, %p53_p0  ;;  %p113_p7 = scmp.lt.s32.totalorder %s2883_s14, 3 }
   0xc   : > { %s3714_s19 = scalar_select %p2953_p4, 1, 0 }
   0xd   : > { %s3715_s20 = scalar_select %p2958_p6, 1, 0 }
   0xe   : > { %p2963_p8 = pnand %p2489_p5, %p113_p7  ;;  %s2885_s22 = smov [#allocation5]  }
   0xf   : > { %s125_s23 = sshll.u32 %s2885_s22, 4  ;;  %s31_s25 = sadd.s32 1, %s2879_s13  ;;  %s126_s23 = int_to_ptr.vmem [resolvable:$true] %s125_s23 }
  0x10   : > { %p2674_p9 = pneg %p2963_p8  ;;  %s2756_s26 = scalar_lea.vmem %s126_s23, 512 }
  0x11   : > { %p2757_p13 = scmp.ne.s32.totalorder %s126_s23, %s2756_s26  ;;  %p2764_p5 = scmp.lt.s32.totalorder %s126_s23, %s126_s23 }
  0x12   : > { %p2972_p11 = pnand %p2674_p9, %p2943_p1  ;;  %p2765_p7 = scmp.lt.s32.totalorder %s2756_s26, %s2756_s26 }
  0x14   : > { %p2747_p12 = pneg %p2972_p11  ;;  %p2766_p6 = por %p2765_p7, %p2764_p5 }
  0x16   : > { %p2759_p0 = pnand %p2757_p13, %p2747_p12 }
  0x18   : > { %p2760_p3 = pneg %p2759_p0 }
  0x1a   : > { %p2767_p4 = pnand %p2766_p6, %p2760_p3 }
  0x1c   : > { %2770 = shalt.err (!%p2767_p4)
}
  0x1d   : > { %s3711_s27 = smov 128   ;;  %s2887_s28 = smov 8  }
  0x1e   : > { %2677 = dma.hbm_to_vmem [thread:$0]  (!%p2972_p11), %s3708_s1, 512, %s126_s23, [#allocation6], %s3711_s27, %s3711_s27, %s2887_s28  }
  0x1f   : > { %p33_p4 = scmp.ge.s32.totalorder %s31_s25, 2  ;;  %s40_s3 = sadd.s32 1, %s2871_s11 }
  0x20   : > { %p47_p6 = scmp.ne.s32.totalorder %s2871_s11, %s2867_s10  ;;  %p48_p9 = scmp.eq.s32.totalorder %s2883_s14, 0 }
  0x21   : > { %s3747_s25 = smov (%p33_p4, %s31_s25), 0  ;;  %p2687_p0 = scmp.lt.s32.totalorder %s2883_s14, 2 }
  0x22   : > { %p2993_p12 = por %p48_p9, %p47_p6  ;;  %p2999_p13 = por %p2947_p2, %p47_p6 }
  0x23   : > { %s35_s6 = ssub.s32 %s2879_s13, %s3747_s25  ;;  %s139_s7 = sand.u32 1, %s2871_s11  }
  0x24   : > { %p38_p11 = scmp.eq.s32.totalorder %s35_s6, 0  ;;  %s2492_s8 = sshll.u32 %s139_s7, 8 }
  0x25   : > { %s2560_s16 = sshll.u32 %s2879_s13, 12  ;;  %s143_s26 = scalar_lea.vmem [#allocation2], %s2492_s8 }
  0x26   : > { %s3008_s15 = scalar_select %p38_p11, %s2871_s11, %s40_s3  }
  0x27   : > { %s152_s24 = scalar_lea.hbm %s3707_s0, %s2560_s16  ;;  %s153_s29 = sshll.u32 %s143_s26, 4  ;;  %s154_s29 = int_to_ptr.vmem [resolvable:$true] %s153_s29 }
  0x28   : > { %p3016_p2 = pnand %p2687_p0, %p2993_p12  ;;  %s140_s30 = scalar_lea.sflag [#allocation3], %s139_s7 }
  0x29   : > { %s2784_s6 = scalar_lea.vmem %s154_s29, 4096  ;;  %s2888_s3 = smov [#allocation2]  }
  0x2a   : > { %p2773_p3 = pneg %p3016_p2  ;;  %p2785_p5 = scmp.ne.s32.totalorder %s154_s29, %s2784_s6 }
  0x2b   : > { %s2789_s27 = sshll.u32 %s2888_s3, 4  ;;  %s2790_s27 = int_to_ptr.vmem [resolvable:$false] %s2789_s27 }
  0x2c   : > { %p2787_p7 = pnand %p2785_p5, %p2773_p3  ;;  %s2791_s16 = scalar_lea.vmem %s2790_s27, 8192 }
  0x2d   : > { %p2792_p6 = scmp.lt.s32.totalorder %s154_s29, %s2790_s27  ;;  %p2793_p9 = scmp.lt.s32.totalorder %s2791_s16, %s2784_s6 }
  0x2e   : > { %p2788_p4 = pneg %p2787_p7 }
  0x2f   : > { %p2794_p11 = por %p2793_p9, %p2792_p6 }
  0x31   : > { %p2795_p10 = pnand %p2794_p11, %p2788_p4 }
  0x33   : > { %2798 = shalt.err (!%p2795_p10)
}
  0x34   : > { %s3721_s4 = smov 128   ;;  %165 = sbr.rel (%p2963_p8) target bundleno = 390 (0x186), region = 28 }
  0x35   : > { %2681 = dma.hbm_to_vmem [thread:$0]  (!%p3016_p2), %s152_s24, 4096, %s154_s29, %s140_s30, %s3721_s4, %s3721_s4, %s2887_s28  }
  0x36   : > { %s3030_s7 = sand.u32 (!%p2963_p8), 1, %s2867_s10   ;;  %p3722_p10 = scmp.ne.s32.totalorder (!%p2963_p8), %s3714_s19, 0 }
  0x37   : > { %s2496_s27 = sshll.u32 (!%p2963_p8), %s3030_s7, 8  ;;  %s168_s8 = scalar_lea.sflag (!%p2963_p8), [#allocation3], %s3030_s7 }
  0x38   : > { %s3034_s22 = scalar_lea.vmem (!%p2963_p8), [#allocation2], %s2496_s27 }
  0x39   : > { %2850 = dma.done.wait (%p3722_p10), %s168_s8, 4096  }
  0x3a   : > { %2852 = vsyncadd (%p3722_p10), %s168_s8, 4294963200 }
  0x3b   : > { %2854 = dma.done.wait (%p2943_p1), [#allocation6], 512  }
  0x3c   : > { %2856 = vsyncadd (%p2943_p1), [#allocation6], 4294966784  ;;  %v219_v0 = vld [vmem:[#allocation5 + $0x18] sm:$0xff]  ;;  %v207_v1 = vld [vmem:[#allocation5 + $0x8] sm:$0xff]  ;;  %vm220_vm0 = vcmask 130048   ;;  %v767_v38 = vlaneseq  ;;  %vm1939_vm1 = vcmask 1040384  }
  0x3d   : > { %v218_v2 = vld [vmem:[#allocation5 + $0x10] sm:$0xff]  ;;  %2602 = vmatprep.subr.mxu0 %v219_v0  ;;  %2618 = vmatprep.subr.mxu1 %v207_v1  ;;  %v206_v3 = vld [vmem:[#allocation5] sm:$0xff]  ;;  %v2500_v6 = vld [vmem:[%s3034_s22 + $0x48] sm:$0xff]  ;;  %v2889_v36 = vmov 1966171168   ;;  %vm2356_vm2 = vcmask 261120  }
  0x3e   : > { %v2499_v4 = vld [vmem:[%s3034_s22 + $0x40] sm:$0xff]  ;;  %2603 = vmatpush3.msra.mxu0 %v219_v0  ;;  %2619 = vmatpush3.msra.mxu1 %v207_v1  ;;  %v199_v7 = vld [vmem:[%s3034_s22 + $0x8] sm:$0xff]  ;;  %v2501_v8 = vld [vmem:[%s3034_s22 + $0x50] sm:$0xff]  ;;  %v765_v37 = vunpack.c.l.s4 %v2889_v36  ;;  %v768_v40 = vshrl.u32 %v767_v38, 7  ;;  %v2890_v50 = vmov 1983009808  }
  0x3f   : > { %v198_v5 = vld [vmem:[%s3034_s22] sm:$0xff]  ;;  %2604 = vmatprep.subr.mxu0 %v218_v2  ;;  %2620 = vmatprep.subr.mxu1 %v206_v3  ;;  %v200_v9 = vld [vmem:[%s3034_s22 + $0x10] sm:$0xff]  ;;  %v2502_v10 = vld [vmem:[%s3034_s22 + $0x58] sm:$0xff]  ;;  %v2071_v51 = vunpack.c.l.s4 %v2890_v50  ;;  %s2498_s17 = sshll.u32 %s3030_s7, 7  ;;  %s2561_s21 = sshll.u32 %s2875_s12, 11 }
  0x40   : > { %2605 = vmatpush3.msra.mxu0 %v218_v2  ;;  %2606 = vmatprep.mubr.msk.f32.mxu0 %vm220_vm0, %v2499_v4  ;;  %v201_v11 = vld [vmem:[%s3034_s22 + $0x18] sm:$0xff]  ;;  %v2503_v12 = vld [vmem:[%s3034_s22 + $0x60] sm:$0xff]  ;;  %v2504_v14 = vld [vmem:[%s3034_s22 + $0x68] sm:$0xff]  ;;  %v766_v39 = vunpack.c.0.s8 %v765_v37  ;;  %s3327_s19 = scalar_lea.vmem [#allocation7], %s2498_s17  ;;  %s3653_s26 = scalar_lea.hbm %s3709_s2, %s2561_s21 }
  0x41   : > { %2621 = vmatpush3.msra.mxu1 %v206_v3  ;;  %2622 = vmatprep.mubr.msk.f32.mxu1 %vm220_vm0, %v198_v5  ;;  %v202_v13 = vld [vmem:[%s3034_s22 + $0x20] sm:$0xff]  ;;  %v203_v15 = vld [vmem:[%s3034_s22 + $0x28] sm:$0xff]  ;;  %v2505_v16 = vld [vmem:[%s3034_s22 + $0x70] sm:$0xff]  ;;  %v2072_v62 = vunpack.c.0.s8 %v2071_v51  ;;  %s2390_s28 = sshll.u32 %s3327_s19, 4  ;;  %s2374_s12 = scalar_lea.sflag [#allocation4], %s3030_s7  ;;  %s3655_s28 = int_to_ptr.vmem [resolvable:$true] %s2390_s28 }
  0x42   : > { %2607 = vmatmul.mubr.msk.f32.vlgmr.msra.gmra.mxu0 %vm220_vm0, %v2500_v6  ;;  %2623 = vmatmul.mubr.msk.f32.vlgmr.msra.gmra.mxu1 %vm220_vm0, %v199_v7  ;;  %v204_v17 = vld [vmem:[%s3034_s22 + $0x30] sm:$0xff]  ;;  %v2506_v18 = vld [vmem:[%s3034_s22 + $0x78] sm:$0xff]  ;;  %v2531_v20 = vld [vmem:[%s3034_s22 + $0xc0] sm:$0xff]  ;;  %v3108_v41 = vsub.s32 %v766_v39, %v768_v40  ;;  %s2799_s29 = scalar_lea.vmem %s3655_s28, 2048  ;;  %s2891_s18 = smov [#allocation7]  }
  0x43   : > { %2634 = vmatprep.subr.mxu0 %v219_v0  ;;  %2650 = vmatprep.subr.mxu1 %v207_v1  ;;  %v205_v19 = vld [vmem:[%s3034_s22 + $0x38] sm:$0xff]  ;;  %v2523_v21 = vld [vmem:[%s3034_s22 + $0x80] sm:$0xff]  ;;  %v2532_v22 = vld [vmem:[%s3034_s22 + $0xc8] sm:$0xff]  ;;  %p2800_p1 = scmp.ne.s32.totalorder %s3655_s28, %s2799_s29  ;;  %s2803_s30 = sshll.u32 %s2891_s18, 4  ;;  %s2804_s30 = int_to_ptr.vmem [resolvable:$false] %s2803_s30 }
  0x44   : > { %2635 = vmatpush3.msra.mxu0 %v219_v0  ;;  %2651 = vmatpush3.msra.mxu1 %v207_v1  ;;  %v2524_v23 = vld [vmem:[%s3034_s22 + $0x88] sm:$0xff]  ;;  %v2533_v24 = vld [vmem:[%s3034_s22 + $0xd0] sm:$0xff]  ;;  %v2534_v26 = vld [vmem:[%s3034_s22 + $0xd8] sm:$0xff]  ;;  %s2805_s6 = scalar_lea.vmem %s2804_s30, 4096  ;;  %p2806_p0 = scmp.lt.s32.totalorder %s3655_s28, %s2804_s30 }
  0x45   : > { %2609 = vmatprep.mubr.msk.f32.mxu0 %vm220_vm0, %v2501_v8  ;;  %2625 = vmatprep.mubr.msk.f32.mxu1 %vm220_vm0, %v200_v9  ;;  %v2525_v25 = vld [vmem:[%s3034_s22 + $0x90] sm:$0xff]  ;;  %v2526_v27 = vld [vmem:[%s3034_s22 + $0x98] sm:$0xff]  ;;  %v2535_v28 = vld [vmem:[%s3034_s22 + $0xe0] sm:$0xff]  ;;  %p2801_p8 = pnand %p2800_p1, %p2999_p13  ;;  %p2807_p2 = scmp.lt.s32.totalorder %s2805_s6, %s2799_s29 }
  0x46   : > { %2610 = vmatmul.mubr.msk.f32.gmra.mxu0 %vm220_vm0, %v2502_v10  ;;  %2626 = vmatmul.mubr.msk.f32.gmra.mxu1 %vm220_vm0, %v201_v11  ;;  %v2527_v29 = vld [vmem:[%s3034_s22 + $0xa0] sm:$0xff]  ;;  %v2536_v30 = vld [vmem:[%s3034_s22 + $0xe8] sm:$0xff]  ;;  %v2537_v32 = vld [vmem:[%s3034_s22 + $0xf0] sm:$0xff]  ;;  %v3124_v10 = vsub.s32 0, %v768_v40 }
  0x47   : > { %2612 = vmatprep.mubr.msk.f32.mxu0 %vm220_vm0, %v2503_v12  ;;  %2628 = vmatprep.mubr.msk.f32.mxu1 %vm220_vm0, %v202_v13  ;;  %v2528_v31 = vld [vmem:[%s3034_s22 + $0xa8] sm:$0xff]  ;;  %v2529_v33 = vld [vmem:[%s3034_s22 + $0xb0] sm:$0xff]  ;;  %v2538_v34 = vld [vmem:[%s3034_s22 + $0xf8] sm:$0xff]  ;;  %p2802_p12 = pneg %p2801_p8  ;;  %p2808_p3 = por %p2807_p2, %p2806_p0 }
  0x48   : > { %2636 = vmatprep.subr.mxu0 %v218_v2  ;;  %2652 = vmatprep.subr.mxu1 %v206_v3  ;;  %v2530_v35 = vld [vmem:[%s3034_s22 + $0xb8] sm:$0xff] }
  0x49   : > { %2637 = vmatpush3.msra.mxu0 %v218_v2  ;;  %2653 = vmatpush3.msra.mxu1 %v206_v3  ;;  %p2809_p5 = pnand %p2808_p3, %p2802_p12 }
  0x4a   : > { %2613 = vmatmul.mubr.msk.f32.gmra.mxu0 %vm220_vm0, %v2504_v14  ;;  %2629 = vmatmul.mubr.msk.f32.gmra.mxu1 %vm220_vm0, %v203_v15  ;;  %v3133_v14 = vsub.s32 %v2072_v62, %v768_v40 }
  0x4b   : > { %2615 = vmatprep.mubr.msk.f32.mxu0 %vm220_vm0, %v2505_v16  ;;  %2631 = vmatprep.mubr.msk.f32.mxu1 %vm220_vm0, %v204_v17 }
  0x4e   : > { %2616 = vmatmul.mubr.msk.f32.gmra.mxu0 %vm220_vm0, %v2506_v18  ;;  %2632 = vmatmul.mubr.msk.f32.gmra.mxu1 %vm220_vm0, %v205_v19 }
  0x4f   : > { %2638 = vmatprep.mubr.msk.f32.mxu0 %vm220_vm0, %v2531_v20  ;;  %2654 = vmatprep.mubr.msk.f32.mxu1 %vm220_vm0, %v2523_v21 }
  0x52   : > { %2639 = vmatmul.mubr.msk.f32.vlgmr.msra.gmra.mxu0 %vm220_vm0, %v2532_v22  ;;  %2655 = vmatmul.mubr.msk.f32.vlgmr.msra.gmra.mxu1 %vm220_vm0, %v2524_v23 }
  0x53   : > { %2641 = vmatprep.mubr.msk.f32.mxu0 %vm220_vm0, %v2533_v24  ;;  %2657 = vmatprep.mubr.msk.f32.mxu1 %vm220_vm0, %v2525_v25 }
  0x56   : > { %2642 = vmatmul.mubr.msk.f32.gmra.mxu0 %vm220_vm0, %v2534_v26  ;;  %2658 = vmatmul.mubr.msk.f32.gmra.mxu1 %vm220_vm0, %v2526_v27 }
  0x57   : > { %2644 = vmatprep.mubr.msk.f32.mxu0 %vm220_vm0, %v2535_v28  ;;  %2660 = vmatprep.mubr.msk.f32.mxu1 %vm220_vm0, %v2527_v29 }
  0x5a   : > { %2645 = vmatmul.mubr.msk.f32.gmra.mxu0 %vm220_vm0, %v2536_v30  ;;  %2661 = vmatmul.mubr.msk.f32.gmra.mxu1 %vm220_vm0, %v2528_v31 }
  0x5b   : > { %2647 = vmatprep.mubr.msk.f32.mxu0 %vm220_vm0, %v2537_v32  ;;  %2663 = vmatprep.mubr.msk.f32.mxu1 %vm220_vm0, %v2529_v33 }
  0x5e   : > { %2648 = vmatmul.mubr.msk.f32.gmra.mxu0 %vm220_vm0, %v2538_v34  ;;  %2664 = vmatmul.mubr.msk.f32.gmra.mxu1 %vm220_vm0, %v2530_v35 }
 0x102   : > { %v2608_v42 = vpop.f32.mrf.mxu0  ;;  %v2624_v43 = vpop.f32.mrf.mxu1 }
 0x103   : > { %v446_v44 = vadd.f32 %v2624_v43, %v2608_v42 }
 0x104   : > { %v311_v45 = vpop.f32.mrf.mxu0  ;;  %v440_v46 = vpop.f32.mrf.mxu1 }
 0x105   : > { %v812_v47 = vcombine.high %v446_v44, %v446_v44  ;;  %v819_v48 = vrot.slane %v446_v44, %v3108_v41  ;;  %v441_v49 = vadd.f32 %v440_v46, %v311_v45 }
 0x106   : > { %v2611_v52 = vpop.f32.mrf.mxu0  ;;  %v2627_v53 = vpop.f32.mrf.mxu1 }
 0x107   : > { %v826_v54 = vrot.slane %v812_v47, %v3108_v41  ;;  %v827_v55 = vcombine.high %v819_v48, %v819_v48  ;;  %v763_v56 = vcombine.high %v441_v49, %v441_v49  ;;  %v770_v57 = vrot.slane %v441_v49, %v3108_v41 }
 0x108   : > { %v456_v58 = vadd.f32 %v2627_v53, %v2611_v52  ;;  %v321_v59 = vpop.f32.mrf.mxu0  ;;  %v450_v60 = vpop.f32.mrf.mxu1  ;;  %v3114_v63 = vrot.slane %v819_v48, %v3108_v41 }
 0x109   : > { %v828_v61 = vcombine.high %v826_v54, %v826_v54  ;;  %v3117_v0 = vrot.slane %v826_v54, %v3108_v41  ;;  %v777_v1 = vrot.slane %v763_v56, %v3108_v41  ;;  %v3121_v5 = vrot.slane %v827_v55, %v3108_v41 }
 0x10a   : > { %v910_v2 = vcombine.high %v456_v58, %v456_v58  ;;  %v2614_v3 = vpop.f32.mrf.mxu0  ;;  %v2630_v4 = vpop.f32.mrf.mxu1  ;;  %v778_v6 = vcombine.high %v770_v57, %v770_v57  ;;  %v917_v7 = vrot.slane %v456_v58, %v3108_v41  ;;  %v3130_v12 = vrot.slane %v770_v57, %v3108_v41 }
 0x10b   : > { %v3127_v11 = vrot.slane %v828_v61, %v3108_v41  ;;  %v857_v15 = vcombine.high %v3114_v63, %v3114_v63  ;;  %v858_v16 = vcombine.high %v3117_v0, %v3117_v0  ;;  %v779_v17 = vcombine.high %v777_v1, %v777_v1 }
 0x10c   : > { %v331_v8 = vpop.f32.mrf.mxu0  ;;  %v460_v9 = vpop.f32.mrf.mxu1  ;;  %v924_v13 = vrot.slane %v910_v2, %v3108_v41  ;;  %v451_v18 = vadd.f32 %v450_v60, %v321_v59  ;;  %v859_v21 = vcombine.high %v3121_v5, %v3121_v5  ;;  %v3142_v22 = vrot.slane %v777_v1, %v3108_v41 }
 0x10d   : > { %v3145_v23 = vrot.slane %v778_v6, %v3108_v41  ;;  %v925_v24 = vcombine.high %v917_v7, %v917_v7  ;;  %v466_v28 = vadd.f32 %v2630_v4, %v2614_v3  ;;  %v860_v29 = vcombine.high %v3127_v11, %v3127_v11 }
 0x10e   : > { %v2617_v19 = vpop.f32.mrf.mxu0  ;;  %v2633_v20 = vpop.f32.mrf.mxu1  ;;  %v926_v25 = vcombine.high %v924_v13, %v924_v13  ;;  %v861_v26 = vcombine.high %v451_v18, %v451_v18  ;;  %v868_v27 = vrot.slane %v451_v18, %v3108_v41  ;;  %v808_v30 = vcombine.high %v3130_v12, %v3130_v12 }
 0x10f   : > { %v3153_v31 = vrot.slane %v917_v7, %v3108_v41  ;;  %v461_v32 = vadd.f32 %v460_v9, %v331_v8  ;;  %v3156_v33 = vrot.slane %v779_v17, %v3108_v41  ;;  %v1008_v36 = vcombine.high %v466_v28, %v466_v28 }
 0x110   : > { %v875_v34 = vrot.slane %v861_v26, %v3108_v41  ;;  %v876_v35 = vcombine.high %v868_v27, %v868_v27  ;;  %v341_v37 = vpop.f32.mrf.mxu0  ;;  %v470_v38 = vpop.f32.mrf.mxu1  ;;  %v3160_v39 = vrot.slane %v924_v13, %v3108_v41  ;;  %v3163_v40 = vrot.slane %v925_v24, %v3108_v41 }
 0x111   : > { %v1015_v42 = vrot.slane %v466_v28, %v3108_v41  ;;  %v959_v43 = vcombine.high %v461_v32, %v461_v32  ;;  %v3167_v44 = vrot.slane %v926_v25, %v3108_v41  ;;  %v3170_v46 = vrot.slane %v868_v27, %v3108_v41 }
 0x112   : > { %v877_v45 = vcombine.high %v875_v34, %v875_v34  ;;  %v966_v47 = vrot.slane %v461_v32, %v3108_v41  ;;  %v3174_v48 = vrot.slane %v875_v34, %v3108_v41  ;;  %v3177_v49 = vrot.slane %v876_v35, %v3108_v41  ;;  %v2640_v56 = vpop.f32.mrf.mxu0  ;;  %v2656_v57 = vpop.f32.mrf.mxu1 }
 0x113   : > { %v1022_v50 = vrot.slane %v1008_v36, %v3108_v41  ;;  %v973_v51 = vrot.slane %v959_v43, %v3108_v41  ;;  %v809_v52 = vcombine.high %v3142_v22, %v3142_v22  ;;  %v810_v53 = vcombine.high %v3145_v23, %v3145_v23 }
 0x114   : > { %v1023_v54 = vcombine.high %v1015_v42, %v1015_v42  ;;  %v3186_v55 = vrot.slane %v1015_v42, %v3108_v41  ;;  %v811_v58 = vcombine.high %v3156_v33, %v3156_v33  ;;  %v955_v59 = vcombine.high %v3153_v31, %v3153_v31  ;;  %v587_v24 = vpop.f32.mrf.mxu0  ;;  %v716_v25 = vpop.f32.mrf.mxu1 }
 0x115   : > { %v956_v60 = vcombine.high %v3160_v39, %v3160_v39  ;;  %v3195_v61 = vrot.slane %v877_v45, %v3108_v41  ;;  %v957_v62 = vcombine.high %v3163_v40, %v3163_v40  ;;  %v958_v1 = vcombine.high %v3167_v44, %v3167_v44 }
 0x116   : > { %v1024_v3 = vcombine.high %v1022_v50, %v1022_v50  ;;  %v974_v7 = vcombine.high %v966_v47, %v966_v47  ;;  %v975_v8 = vcombine.high %v973_v51, %v973_v51  ;;  %v3208_v9 = vrot.slane %v1022_v50, %v3108_v41 }
 0x117   : > { %v3211_v13 = vrot.slane %v1023_v54, %v3108_v41  ;;  %v476_v18 = vadd.f32 %v2633_v20, %v2617_v19  ;;  %v3218_v27 = vrot.slane %v966_v47, %v3108_v41  ;;  %v471_v28 = vadd.f32 %v470_v38, %v341_v37 }
 0x118   : > { %v722_v32 = vadd.f32 %v2656_v57, %v2640_v56  ;;  %v3221_v34 = vrot.slane %v1024_v3, %v3108_v41  ;;  %v3224_v35 = vrot.slane %v973_v51, %v3108_v41  ;;  %v3228_v19 = vrot.slane %v974_v7, %v3108_v41 }
 0x119   : > { %v1106_v36 = vcombine.high %v476_v18, %v476_v18  ;;  %v1113_v42 = vrot.slane %v476_v18, %v3108_v41  ;;  %v3231_v20 = vrot.slane %v975_v8, %v3108_v41  ;;  %v717_v45 = vadd.f32 %v716_v25, %v587_v24 }
 0x11a   : > { %v1276_v43 = vcombine.high %v722_v32, %v722_v32  ;;  %v1057_v47 = vcombine.high %v471_v28, %v471_v28  ;;  %v1283_v50 = vrot.slane %v722_v32, %v3108_v41  ;;  %v3241_v56 = vrot.slane %v471_v28, %v3108_v41 }
 0x11b   : > { %v1120_v37 = vrot.slane %v1106_v36, %v3108_v41  ;;  %v1121_v38 = vcombine.high %v1113_v42, %v1113_v42  ;;  %v3238_v54 = vrot.slane %v1113_v42, %v3108_v41  ;;  %v1227_v32 = vcombine.high %v717_v45, %v717_v45 }
 0x11c   : > { %v1290_v57 = vrot.slane %v1276_v43, %v3108_v41  ;;  %v3263_v43 = vrot.slane %v1057_v47, %v3108_v41  ;;  %v1299_v3 = vrot.slane %v1283_v50, %v3108_v41  ;;  %v1234_v25 = vrot.slane %v717_v45, %v3108_v41 }
 0x11d   : > { %v1122_v8 = vcombine.high %v1120_v37, %v1120_v37  ;;  %v3249_v18 = vrot.slane %v1120_v37, %v3108_v41  ;;  %v3256_v28 = vrot.slane %v1121_v38, %v3108_v41  ;;  %v1291_v37 = vcombine.high %v1283_v50, %v1283_v50 }
 0x11e   : > { %v1292_v24 = vcombine.high %v1290_v57, %v1290_v57  ;;  %v1306_v42 = vrot.slane %v1290_v57, %v3108_v41  ;;  %v1241_v17 = vrot.slane %v1227_v32, %v3108_v41  ;;  %v1321_v38 = vcombine.high %v1299_v3, %v1299_v3 }
 0x11f   : > { %v3266_v7 = vrot.slane %v1122_v8, %v3108_v41  ;;  %v1313_v47 = vrot.slane %v1291_v37, %v3108_v41  ;;  %v1654_v36 = vrot.slane %v1299_v3, %v3124_v10 }
 0x120   : > { %v1320_v51 = vrot.slane %v1292_v24, %v3108_v41  ;;  %v1322_v26 = vcombine.high %v1306_v42, %v1306_v42  ;;  %v1670_v37 = vrot.slane %v1306_v42, %v3124_v10  ;;  %v1662_v24 = vrot.slane %v1321_v38, %v3124_v10 }
 0x121   : > { %v1323_v4 = vcombine.high %v1313_v47, %v1313_v47  ;;  %v1658_v57 = vrot.slane %v1313_v47, %v3124_v10  ;;  %v1948_v6 = vsel %vm1939_vm1, %v3114_v63, %v1654_v36  ;;  %v2643_v47 = vpop.f32.mrf.mxu0 }
 0x122   : > { %v1324_v50 = vcombine.high %v1320_v51, %v1320_v51  ;;  %v1674_v8 = vrot.slane %v1320_v51, %v3124_v10  ;;  %v1678_v32 = vrot.slane %v1322_v26, %v3124_v10  ;;  %v1952_v42 = vsel %vm1939_vm1, %v3117_v0, %v1670_v37 }
 0x123   : > { %v1666_v45 = vrot.slane %v1323_v4, %v3124_v10  ;;  %v1949_v2 = vsel %vm1939_vm1, %v3121_v5, %v1658_v57  ;;  %v1950_v4 = vsel %vm1939_vm1, %v857_v15, %v1662_v24  ;;  %v1242_v57 = vcombine.high %v1234_v25, %v1234_v25 }
 0x124   : > { %v1682_v3 = vrot.slane %v1324_v50, %v3124_v10  ;;  %v1953_v51 = vsel %vm1939_vm1, %v3127_v11, %v1674_v8  ;;  %v1954_v36 = vsel %vm1939_vm1, %v858_v16, %v1678_v32  ;;  %v2102_v38 = vcombine.low %v1948_v6, %v1949_v2  ;;  %v2659_v50 = vpop.f32.mrf.mxu1 }
 0x125   : > { %v1951_v26 = vsel %vm1939_vm1, %v859_v21, %v1666_v45  ;;  %v2119_v8 = vcombine.low %v1952_v42, %v1953_v51  ;;  %v1243_v37 = vcombine.high %v1241_v17, %v1241_v17  ;;  %v1250_v0 = vrot.slane %v1234_v25, %v3108_v41 }
 0x126   : > { %v1955_v63 = vsel %vm1939_vm1, %v860_v29, %v1682_v3  ;;  %v2103_v15 = vcombine.low %v1950_v4, %v1951_v26  ;;  %v2110_v5 = vrot.slane %v2102_v38, %v3133_v14  ;;  %v1257_v6 = vrot.slane %v1241_v17, %v3108_v41  ;;  %v597_v3 = vpop.f32.mrf.mxu0  ;;  %v726_v42 = vpop.f32.mrf.mxu1 }
 0x127   : > { %v2120_v21 = vcombine.low %v1954_v36, %v1955_v63  ;;  %v2127_v2 = vrot.slane %v2119_v8, %v3133_v14  ;;  %v1264_v24 = vrot.slane %v1242_v57, %v3108_v41  ;;  %v1271_v29 = vrot.slane %v1243_v37, %v3108_v41 }
 0x128   : > { %v2117_v16 = vrot.slane %v2103_v15, %v3133_v14  ;;  %v1272_v45 = vcombine.high %v1250_v0, %v1250_v0  ;;  %v1622_v32 = vrot.slane %v1250_v0, %v3124_v10  ;;  %v1273_v4 = vcombine.high %v1257_v6, %v1257_v6 }
 0x129   : > { %v2134_v11 = vrot.slane %v2120_v21, %v3133_v14  ;;  %v1274_v25 = vcombine.high %v1264_v24, %v1264_v24  ;;  %v1626_v26 = vrot.slane %v1264_v24, %v3124_v10  ;;  %v1275_v38 = vcombine.high %v1271_v29, %v1271_v29 }
 0x12a   : > { %v2118_v51 = vcombine.low %v2110_v5, %v2117_v16  ;;  %v1630_v17 = vrot.slane %v1272_v45, %v3124_v10  ;;  %v1638_v63 = vrot.slane %v1257_v6, %v3124_v10  ;;  %v1642_v8 = vrot.slane %v1271_v29, %v3124_v10  ;;  %v2662_v6 = vpop.f32.mrf.mxu1 }
 0x12b   : > { %v2135_v36 = vcombine.low %v2127_v2, %v2134_v11  ;;  %v1634_v15 = vrot.slane %v1274_v25, %v3124_v10  ;;  %v1646_v57 = vrot.slane %v1273_v4, %v3124_v10  ;;  %v1940_v5 = vsel %vm1939_vm1, %v3130_v12, %v1622_v32  ;;  %v2646_v2 = vpop.f32.mrf.mxu0 }
 0x12c   : > { %2359 = vst.msk [vmem:[%s3327_s19 + $0x10] sm:$0xff] %vm2356_vm2, %v2118_v51  ;;  %v1650_v21 = vrot.slane %v1275_v38, %v3124_v10  ;;  %v1941_v37 = vsel %vm1939_vm1, %v3145_v23, %v1626_v26  ;;  %v1942_v0 = vsel %vm1939_vm1, %v808_v30, %v1630_v17  ;;  %v1944_v16 = vsel %vm1939_vm1, %v3142_v22, %v1638_v63 }
 0x12d   : > { %2360 = vst.msk [vmem:[%s3327_s19 + $0x18] sm:$0xff] %vm2356_vm2, %v2135_v36  ;;  %v1943_v24 = vsel %vm1939_vm1, %v810_v53, %v1634_v15  ;;  %v1945_v11 = vsel %vm1939_vm1, %v3156_v33, %v1642_v8  ;;  %v1946_v12 = vsel %vm1939_vm1, %v809_v52, %v1646_v57  ;;  %v2068_v29 = vcombine.low %v1940_v5, %v1941_v37 }
 0x12e   : > { %v1947_v30 = vsel %vm1939_vm1, %v811_v58, %v1650_v21  ;;  %v2069_v45 = vcombine.low %v1942_v0, %v1943_v24  ;;  %v2085_v32 = vcombine.low %v1944_v16, %v1945_v11  ;;  %v732_v51 = vadd.f32 %v2659_v50, %v2643_v47 }
 0x12f   : > { %v2076_v23 = vrot.slane %v2068_v29, %v3133_v14  ;;  %v2086_v53 = vcombine.low %v1946_v12, %v1947_v30  ;;  %v727_v4 = vadd.f32 %v726_v42, %v597_v3  ;;  %v3362_v25 = vadd.f32 %v2662_v6, %v2646_v2 }
 0x130   : > { %v2083_v26 = vrot.slane %v2069_v45, %v3133_v14  ;;  %v2093_v22 = vrot.slane %v2085_v32, %v3133_v14  ;;  %v1374_v52 = vcombine.high %v732_v51, %v732_v51  ;;  %v1381_v36 = vrot.slane %v732_v51, %v3108_v41 }
 0x131   : > { %v2100_v33 = vrot.slane %v2086_v53, %v3133_v14  ;;  %v1325_v58 = vcombine.high %v727_v4, %v727_v4  ;;  %v1332_v47 = vrot.slane %v727_v4, %v3108_v41  ;;  %v1472_v50 = vcombine.high %v3362_v25, %v3362_v25 }
 0x132   : > { %v2084_v3 = vcombine.low %v2076_v23, %v2083_v26  ;;  %v1388_v42 = vrot.slane %v1374_v52, %v3108_v41  ;;  %v1389_v38 = vcombine.high %v1381_v36, %v1381_v36  ;;  %v1397_v17 = vrot.slane %v1381_v36, %v3108_v41 }
 0x133   : > { %v2101_v63 = vcombine.low %v2093_v22, %v2100_v33  ;;  %v1339_v15 = vrot.slane %v1325_v58, %v3108_v41  ;;  %v1340_v8 = vcombine.high %v1332_v47, %v1332_v47  ;;  %v1348_v57 = vrot.slane %v1332_v47, %v3108_v41 }
 0x134   : > { %2357 = vst.msk [vmem:[%s3327_s19] sm:$0xff] %vm2356_vm2, %v2084_v3  ;;  %v1390_v5 = vcombine.high %v1388_v42, %v1388_v42  ;;  %v1404_v21 = vrot.slane %v1388_v42, %v3108_v41  ;;  %v1411_v37 = vrot.slane %v1389_v38, %v3108_v41  ;;  %v1419_v0 = vcombine.high %v1397_v17, %v1397_v17 }
 0x135   : > { %2358 = vst.msk [vmem:[%s3327_s19 + $0x8] sm:$0xff] %vm2356_vm2, %v2101_v63  ;;  %v1718_v16 = vrot.slane %v1397_v17, %v3124_v10  ;;  %v1341_v2 = vcombine.high %v1339_v15, %v1339_v15  ;;  %v1355_v6 = vrot.slane %v1339_v15, %v3108_v41  ;;  %v1362_v24 = vrot.slane %v1340_v8, %v3108_v41 }
 0x136   : > { %v1418_v11 = vrot.slane %v1390_v5, %v3108_v41  ;;  %v1420_v12 = vcombine.high %v1404_v21, %v1404_v21  ;;  %v1421_v29 = vcombine.high %v1411_v37, %v1411_v37  ;;  %v1722_v30 = vrot.slane %v1411_v37, %v3124_v10  ;;  %v607_v37 = vpop.f32.mrf.mxu0 }
 0x137   : > { %v1726_v45 = vrot.slane %v1419_v0, %v3124_v10  ;;  %v1734_v32 = vrot.slane %v1404_v21, %v3124_v10  ;;  %v1964_v51 = vsel %vm1939_vm1, %v3153_v31, %v1718_v16  ;;  %v1369_v23 = vrot.slane %v1341_v2, %v3108_v41  ;;  %v736_v0 = vpop.f32.mrf.mxu1 }
 0x138   : > { %v1422_v53 = vcombine.high %v1418_v11, %v1418_v11  ;;  %v1730_v4 = vrot.slane %v1421_v29, %v3124_v10  ;;  %v1738_v26 = vrot.slane %v1418_v11, %v3124_v10  ;;  %v1742_v22 = vrot.slane %v1420_v12, %v3124_v10 }
 0x139   : > { %v1965_v52 = vsel %vm1939_vm1, %v3163_v40, %v1722_v30  ;;  %v1966_v36 = vsel %vm1939_vm1, %v955_v59, %v1726_v45  ;;  %v1968_v33 = vsel %vm1939_vm1, %v3160_v39, %v1734_v32  ;;  %v1370_v58 = vcombine.high %v1348_v57, %v1348_v57 }
 0x13a   : > { %v1746_v47 = vrot.slane %v1422_v53, %v3124_v10  ;;  %v1967_v3 = vsel %vm1939_vm1, %v957_v62, %v1730_v4  ;;  %v1969_v42 = vsel %vm1939_vm1, %v3167_v44, %v1738_v26  ;;  %v1970_v31 = vsel %vm1939_vm1, %v956_v60, %v1742_v22  ;;  %v2649_v22 = vpop.f32.mrf.mxu0 }
 0x13b   : > { %v2170_v59 = vcombine.low %v1964_v51, %v1965_v52  ;;  %v2171_v38 = vcombine.low %v1966_v36, %v1967_v3  ;;  %v2187_v17 = vcombine.low %v1968_v33, %v1969_v42  ;;  %v1371_v63 = vcombine.high %v1355_v6, %v1355_v6  ;;  %v2665_v52 = vpop.f32.mrf.mxu1 }
 0x13c   : > { %v1971_v15 = vsel %vm1939_vm1, %v958_v1, %v1746_v47  ;;  %v1372_v40 = vcombine.high %v1362_v24, %v1362_v24  ;;  %v1373_v8 = vcombine.high %v1369_v23, %v1369_v23  ;;  %v1686_v62 = vrot.slane %v1348_v57, %v3124_v10 }
 0x13d   : > { %v2178_v5 = vrot.slane %v2170_v59, %v3133_v14  ;;  %v2185_v21 = vrot.slane %v2171_v38, %v3133_v14  ;;  %v2188_v39 = vcombine.low %v1970_v31, %v1971_v15  ;;  %v2195_v60 = vrot.slane %v2187_v17, %v3133_v14 }
 0x13e   : > { %v1690_v16 = vrot.slane %v1362_v24, %v3124_v10  ;;  %v1694_v44 = vrot.slane %v1370_v58, %v3124_v10  ;;  %v1698_v1 = vrot.slane %v1372_v40, %v3124_v10  ;;  %v1702_v2 = vrot.slane %v1355_v6, %v3124_v10 }
 0x13f   : > { %v2186_v11 = vcombine.low %v2178_v5, %v2185_v21  ;;  %v2202_v57 = vrot.slane %v2188_v39, %v3133_v14  ;;  %v1706_v12 = vrot.slane %v1369_v23, %v3124_v10  ;;  %v1710_v29 = vrot.slane %v1371_v63, %v3124_v10 }
 0x140   : > { %v1714_v30 = vrot.slane %v1373_v8, %v3124_v10  ;;  %v1956_v45 = vsel %vm1939_vm1, %v3170_v46, %v1686_v62  ;;  %v1957_v24 = vsel %vm1939_vm1, %v3177_v49, %v1690_v16  ;;  %v3723_v32 = vcombine.high %v3170_v46, %v3170_v46 }
 0x141   : > { %v2203_v51 = vcombine.low %v2195_v60, %v2202_v57  ;;  %2363 = vst.msk [vmem:[%s3327_s19 + $0x30] sm:$0xff] %vm2356_vm2, %v2186_v11  ;;  %v3724_v23 = vcombine.high %v3177_v49, %v3177_v49  ;;  %v1960_v4 = vsel %vm1939_vm1, %v3174_v48, %v1702_v2  ;;  %v1961_v26 = vsel %vm1939_vm1, %v3195_v61, %v1706_v12 }
 0x142   : > { %v1958_v6 = vsel %vm1939_vm1, %v3723_v32, %v1694_v44  ;;  %v3725_v46 = vcombine.high %v3174_v48, %v3174_v48  ;;  %v3726_v33 = vcombine.high %v3195_v61, %v3195_v61  ;;  %v2136_v58 = vcombine.low %v1956_v45, %v1957_v24 }
 0x143   : > { %v1959_v53 = vsel %vm1939_vm1, %v3724_v23, %v1698_v1  ;;  %2364 = vst.msk [vmem:[%s3327_s19 + $0x38] sm:$0xff] %vm2356_vm2, %v2203_v51  ;;  %v2153_v3 = vcombine.low %v1960_v4, %v1961_v26  ;;  %v1479_v31 = vrot.slane %v3362_v25, %v3108_v41  ;;  %v1486_v48 = vrot.slane %v1472_v50, %v3108_v41 }
 0x144   : > { %v1962_v36 = vsel %vm1939_vm1, %v3725_v46, %v1710_v29  ;;  %v1963_v49 = vsel %vm1939_vm1, %v3726_v33, %v1714_v30  ;;  %v2137_v47 = vcombine.low %v1958_v6, %v1959_v53  ;;  %v2144_v59 = vrot.slane %v2136_v58, %v3133_v14 }
 0x145   : > { %v2154_v42 = vcombine.low %v1962_v36, %v1963_v49  ;;  %v737_v38 = vadd.f32 %v736_v0, %v607_v37  ;;  %v3465_v17 = vadd.f32 %v2665_v52, %v2649_v22  ;;  %v2161_v63 = vrot.slane %v2153_v3, %v3133_v14 }
 0x146   : > { %v2151_v61 = vrot.slane %v2137_v47, %v3133_v14  ;;  %v1487_v40 = vcombine.high %v1479_v31, %v1479_v31  ;;  %v1488_v8 = vcombine.high %v1486_v48, %v1486_v48  ;;  %v1495_v5 = vrot.slane %v1479_v31, %v3108_v41 }
 0x147   : > { %v2168_v15 = vrot.slane %v2154_v42, %v3133_v14  ;;  %v1502_v25 = vrot.slane %v1486_v48, %v3108_v41  ;;  %v1423_v50 = vcombine.high %v737_v38, %v737_v38  ;;  %v1430_v37 = vrot.slane %v737_v38, %v3108_v41 }
 0x148   : > { %v2152_v62 = vcombine.low %v2144_v59, %v2151_v61  ;;  %v1509_v39 = vrot.slane %v1487_v40, %v3108_v41  ;;  %v1516_v60 = vrot.slane %v1488_v8, %v3108_v41  ;;  %v1517_v0 = vcombine.high %v1495_v5, %v1495_v5 }
 0x149   : > { %v2169_v21 = vcombine.low %v2161_v63, %v2168_v15  ;;  %v1518_v16 = vcombine.high %v1502_v25, %v1502_v25  ;;  %v1782_v44 = vrot.slane %v1495_v5, %v3124_v10  ;;  %v1798_v1 = vrot.slane %v1502_v25, %v3124_v10 }
 0x14a   : > { %2361 = vst.msk [vmem:[%s3327_s19 + $0x20] sm:$0xff] %vm2356_vm2, %v2152_v62  ;;  %v1519_v2 = vcombine.high %v1509_v39, %v1509_v39  ;;  %v1520_v11 = vcombine.high %v1516_v60, %v1516_v60  ;;  %v1786_v57 = vrot.slane %v1509_v39, %v3124_v10  ;;  %v1802_v12 = vrot.slane %v1516_v60, %v3124_v10 }
 0x14b   : > { %2362 = vst.msk [vmem:[%s3327_s19 + $0x28] sm:$0xff] %vm2356_vm2, %v2169_v21  ;;  %v1790_v29 = vrot.slane %v1517_v0, %v3124_v10  ;;  %v1806_v30 = vrot.slane %v1518_v16, %v3124_v10  ;;  %v1980_v45 = vsel %vm1939_vm1, %v3186_v55, %v1782_v44  ;;  %v1984_v24 = vsel %vm1939_vm1, %v3208_v9, %v1798_v1 }
 0x14c   : > { %v1794_v32 = vrot.slane %v1519_v2, %v3124_v10  ;;  %v1810_v6 = vrot.slane %v1520_v11, %v3124_v10  ;;  %v1981_v51 = vsel %vm1939_vm1, %v3211_v13, %v1786_v57  ;;  %v1985_v23 = vsel %vm1939_vm1, %v3221_v34, %v1802_v12 }
 0x14d   : > { %v3727_v53 = vcombine.high %v3186_v55, %v3186_v55  ;;  %v3728_v26 = vcombine.high %v3208_v9, %v3208_v9  ;;  %v2238_v52 = vcombine.low %v1980_v45, %v1981_v51  ;;  %v2255_v46 = vcombine.low %v1984_v24, %v1985_v23 }
 0x14e   : > { %v3729_v36 = vcombine.high %v3211_v13, %v3211_v13  ;;  %v3730_v49 = vcombine.high %v3221_v34, %v3221_v34  ;;  %v1437_v55 = vrot.slane %v1423_v50, %v3108_v41  ;;  %v1438_v47 = vcombine.high %v1430_v37, %v1430_v37 }
 0x14f   : > { %v1982_v4 = vsel %vm1939_vm1, %v3727_v53, %v1790_v29  ;;  %v1986_v22 = vsel %vm1939_vm1, %v3728_v26, %v1806_v30  ;;  %v2246_v9 = vrot.slane %v2238_v52, %v3133_v14  ;;  %v2263_v31 = vrot.slane %v2255_v46, %v3133_v14 }
 0x150   : > { %v1983_v33 = vsel %vm1939_vm1, %v3729_v36, %v1794_v32  ;;  %v1987_v58 = vsel %vm1939_vm1, %v3730_v49, %v1810_v6  ;;  %v1439_v48 = vcombine.high %v1437_v55, %v1437_v55  ;;  %v1446_v59 = vrot.slane %v1430_v37, %v3108_v41 }
 0x151   : > { %v2239_v3 = vcombine.low %v1982_v4, %v1983_v33  ;;  %v2256_v42 = vcombine.low %v1986_v22, %v1987_v58  ;;  %v1453_v13 = vrot.slane %v1437_v55, %v3108_v41  ;;  %v1460_v61 = vrot.slane %v1438_v47, %v3108_v41 }
 0x152   : > { %v1570_v63 = vcombine.high %v3465_v17, %v3465_v17  ;;  %v1577_v15 = vrot.slane %v3465_v17, %v3108_v41  ;;  %v1467_v40 = vrot.slane %v1439_v48, %v3108_v41  ;;  %v1468_v8 = vcombine.high %v1446_v59, %v1446_v59 }
 0x153   : > { %v2253_v34 = vrot.slane %v2239_v3, %v3133_v14  ;;  %v2270_v38 = vrot.slane %v2256_v42, %v3133_v14  ;;  %v1469_v62 = vcombine.high %v1453_v13, %v1453_v13  ;;  %v1470_v5 = vcombine.high %v1460_v61, %v1460_v61 }
 0x154   : > { %v1750_v21 = vrot.slane %v1446_v59, %v3124_v10  ;;  %v1754_v39 = vrot.slane %v1460_v61, %v3124_v10  ;;  %v1471_v60 = vcombine.high %v1467_v40, %v1467_v40  ;;  %v1758_v37 = vrot.slane %v1468_v8, %v3124_v10  ;;  %v617_v59 = vpop.f32.mrf.mxu0 }
 0x155   : > { %v2254_v25 = vcombine.low %v2246_v9, %v2253_v34  ;;  %v2271_v50 = vcombine.low %v2263_v31, %v2270_v38  ;;  %v1762_v0 = vrot.slane %v1470_v5, %v3124_v10  ;;  %v1766_v16 = vrot.slane %v1453_v13, %v3124_v10  ;;  %v746_v13 = vpop.f32.mrf.mxu1 }
 0x156   : > { %v1770_v17 = vrot.slane %v1467_v40, %v3124_v10  ;;  %v1774_v44 = vrot.slane %v1469_v62, %v3124_v10  ;;  %v1972_v1 = vsel %vm1939_vm1, %v3218_v27, %v1750_v21  ;;  %v1973_v2 = vsel %vm1939_vm1, %v3228_v19, %v1754_v39 }
 0x157   : > { %2367 = vst.msk [vmem:[%s3327_s19 + $0x50] sm:$0xff] %vm2356_vm2, %v2254_v25  ;;  %2368 = vst.msk [vmem:[%s3327_s19 + $0x58] sm:$0xff] %vm2356_vm2, %v2271_v50  ;;  %v1778_v11 = vrot.slane %v1471_v60, %v3124_v10  ;;  %v3731_v57 = vcombine.high %v3218_v27, %v3218_v27  ;;  %v3732_v29 = vcombine.high %v3228_v19, %v3228_v19 }
 0x158   : > { %v1976_v45 = vsel %vm1939_vm1, %v3224_v35, %v1766_v16  ;;  %v1977_v24 = vsel %vm1939_vm1, %v3231_v20, %v1770_v17  ;;  %v3733_v32 = vcombine.high %v3224_v35, %v3224_v35  ;;  %v2204_v51 = vcombine.low %v1972_v1, %v1973_v2 }
 0x159   : > { %v1974_v12 = vsel %vm1939_vm1, %v3731_v57, %v1758_v37  ;;  %v1975_v30 = vsel %vm1939_vm1, %v3732_v29, %v1762_v0  ;;  %v3734_v23 = vcombine.high %v3231_v20, %v3231_v20  ;;  %v2221_v53 = vcombine.low %v1976_v45, %v1977_v24 }
 0x15a   : > { %v1978_v6 = vsel %vm1939_vm1, %v3733_v32, %v1774_v44  ;;  %v2205_v27 = vcombine.low %v1974_v12, %v1975_v30  ;;  %v1584_v4 = vrot.slane %v1570_v63, %v3108_v41  ;;  %v1585_v26 = vcombine.high %v1577_v15, %v1577_v15 }
 0x15b   : > { %v1979_v19 = vsel %vm1939_vm1, %v3734_v23, %v1778_v11  ;;  %v2212_v22 = vrot.slane %v2204_v51, %v3133_v14  ;;  %v1593_v35 = vrot.slane %v1577_v15, %v3108_v41  ;;  %v2229_v36 = vrot.slane %v2221_v53, %v3133_v14 }
 0x15c   : > { %v2219_v52 = vrot.slane %v2205_v27, %v3133_v14  ;;  %v2222_v46 = vcombine.low %v1978_v6, %v1979_v19  ;;  %v1586_v33 = vcombine.high %v1584_v4, %v1584_v4  ;;  %v1600_v49 = vrot.slane %v1584_v4, %v3108_v41 }
 0x15d   : > { %v1607_v20 = vrot.slane %v1585_v26, %v3108_v41  ;;  %v1615_v47 = vcombine.high %v1593_v35, %v1593_v35  ;;  %v1846_v3 = vrot.slane %v1593_v35, %v3124_v10  ;;  %v1154_v61 = vcombine.high %v3266_v7, %v3266_v7 }
 0x15e   : > { %v2220_v58 = vcombine.low %v2212_v22, %v2219_v52  ;;  %v2236_v55 = vrot.slane %v2222_v46, %v3133_v14  ;;  %v1614_v9 = vrot.slane %v1586_v33, %v3108_v41  ;;  %v1616_v42 = vcombine.high %v1600_v49, %v1600_v49 }
 0x15f   : > { %v1617_v31 = vcombine.high %v1607_v20, %v1607_v20  ;;  %v1850_v48 = vrot.slane %v1607_v20, %v3124_v10  ;;  %v1854_v38 = vrot.slane %v1615_v47, %v3124_v10  ;;  %v1862_v63 = vrot.slane %v1600_v49, %v3124_v10 }
 0x160   : > { %v2237_v34 = vcombine.low %v2229_v36, %v2236_v55  ;;  %2365 = vst.msk [vmem:[%s3327_s19 + $0x40] sm:$0xff] %vm2356_vm2, %v2220_v58  ;;  %v1618_v15 = vcombine.high %v1614_v9, %v1614_v9  ;;  %v1866_v8 = vrot.slane %v1614_v9, %v3124_v10  ;;  %v1870_v62 = vrot.slane %v1616_v42, %v3124_v10 }
 0x161   : > { %v1858_v40 = vrot.slane %v1617_v31, %v3124_v10  ;;  %v1996_v5 = vsel %vm1939_vm1, %v3238_v54, %v1846_v3  ;;  %v1997_v25 = vsel %vm1939_vm1, %v3256_v28, %v1850_v48  ;;  %v3735_v50 = vcombine.high %v3238_v54, %v3238_v54 }
 0x162   : > { %2366 = vst.msk [vmem:[%s3327_s19 + $0x48] sm:$0xff] %vm2356_vm2, %v2237_v34  ;;  %v747_v39 = vadd.f32 %v746_v13, %v617_v59  ;;  %v1874_v60 = vrot.slane %v1618_v15, %v3124_v10  ;;  %v3736_v37 = vcombine.high %v3256_v28, %v3256_v28  ;;  %v2000_v16 = vsel %vm1939_vm1, %v3249_v18, %v1862_v63 }
 0x163   : > { %v1998_v21 = vsel %vm1939_vm1, %v3735_v50, %v1854_v38  ;;  %v2001_v17 = vsel %vm1939_vm1, %v3266_v7, %v1866_v8  ;;  %v2306_v44 = vcombine.low %v1996_v5, %v1997_v25  ;;  %v1080_v11 = vrot.slane %v3241_v56, %v3108_v41 }
 0x164   : > { %v1999_v0 = vsel %vm1939_vm1, %v3736_v37, %v1858_v40  ;;  %v2323_v2 = vcombine.low %v2000_v16, %v2001_v17  ;;  %v1521_v54 = vcombine.high %v747_v39, %v747_v39  ;;  %v3737_v57 = vcombine.high %v3249_v18, %v3249_v18 }
 0x165   : > { %v2307_v1 = vcombine.low %v1998_v21, %v1999_v0  ;;  %v2003_v12 = vsel %vm1939_vm1, %v1154_v61, %v1874_v60  ;;  %v1528_v29 = vrot.slane %v747_v39, %v3108_v41  ;;  %v1073_v30 = vcombine.high %v3263_v43, %v3263_v43 }
 0x166   : > { %v2002_v28 = vsel %vm1939_vm1, %v3737_v57, %v1870_v62  ;;  %v2314_v7 = vrot.slane %v2306_v44, %v3133_v14  ;;  %v1087_v32 = vrot.slane %v3263_v43, %v3108_v41  ;;  %v1535_v18 = vrot.slane %v1521_v54, %v3108_v41 }
 0x167   : > { %v2321_v45 = vrot.slane %v2307_v1, %v3133_v14  ;;  %v2324_v24 = vcombine.low %v2002_v28, %v2003_v12  ;;  %v1536_v6 = vcombine.high %v1528_v29, %v1528_v29  ;;  %v1544_v51 = vrot.slane %v1528_v29, %v3108_v41 }
 0x168   : > { %v3738_v27 = vcombine.high %v3241_v56, %v3241_v56  ;;  %v2331_v53 = vrot.slane %v2323_v2, %v3133_v14  ;;  %v1537_v26 = vcombine.high %v1535_v18, %v1535_v18  ;;  %v1551_v22 = vrot.slane %v1535_v18, %v3108_v41 }
 0x169   : > { %v2322_v19 = vcombine.low %v2314_v7, %v2321_v45  ;;  %v2338_v4 = vrot.slane %v2324_v24, %v3133_v14  ;;  %v1558_v43 = vrot.slane %v1536_v6, %v3108_v41  ;;  %v1566_v52 = vcombine.high %v1544_v51, %v1544_v51 }
 0x16a   : > { %v1094_v23 = vrot.slane %v3738_v27, %v3108_v41  ;;  %v1101_v46 = vrot.slane %v1073_v30, %v3108_v41  ;;  %v1102_v35 = vcombine.high %v1080_v11, %v1080_v11  ;;  %v1814_v56 = vrot.slane %v1544_v51, %v3124_v10 }
 0x16b   : > { %v2339_v36 = vcombine.low %v2331_v53, %v2338_v4  ;;  %2371 = vst.msk [vmem:[%s3327_s19 + $0x70] sm:$0xff] %vm2356_vm2, %v2322_v19  ;;  %v1565_v33 = vrot.slane %v1537_v26, %v3108_v41  ;;  %v1567_v49 = vcombine.high %v1551_v22, %v1551_v22  ;;  %v1568_v20 = vcombine.high %v1558_v43, %v1558_v43 }
 0x16c   : > { %v1818_v58 = vrot.slane %v1558_v43, %v3124_v10  ;;  %v1103_v55 = vcombine.high %v1087_v32, %v1087_v32  ;;  %v1104_v47 = vcombine.high %v1094_v23, %v1094_v23  ;;  %v1822_v3 = vrot.slane %v1566_v52, %v3124_v10 }
 0x16d   : > { %2372 = vst.msk [vmem:[%s3327_s19 + $0x78] sm:$0xff] %vm2356_vm2, %v2339_v36  ;;  %v1830_v9 = vrot.slane %v1551_v22, %v3124_v10  ;;  %v1569_v42 = vcombine.high %v1565_v33, %v1565_v33  ;;  %v1826_v31 = vrot.slane %v1568_v20, %v3124_v10  ;;  %v1834_v48 = vrot.slane %v1565_v33, %v3124_v10 }
 0x16e   : > { %v1838_v59 = vrot.slane %v1567_v49, %v3124_v10  ;;  %v1105_v41 = vcombine.high %v1101_v46, %v1101_v46  ;;  %v1988_v13 = vsel %vm1939_vm1, %v1080_v11, %v1814_v56  ;;  %v1989_v61 = vsel %vm1939_vm1, %v1094_v23, %v1818_v58 }
 0x16f   : > { %v1990_v34 = vsel %vm1939_vm1, %v1102_v35, %v1822_v3  ;;  %v1842_v38 = vrot.slane %v1569_v42, %v3124_v10  ;;  %v1991_v63 = vsel %vm1939_vm1, %v1104_v47, %v1826_v31  ;;  %v1992_v15 = vsel %vm1939_vm1, %v1087_v32, %v1830_v9 }
 0x170   : > { %v1993_v40 = vsel %vm1939_vm1, %v1101_v46, %v1834_v48  ;;  %v2272_v8 = vcombine.low %v1988_v13, %v1989_v61  ;;  %v2273_v62 = vcombine.low %v1990_v34, %v1991_v63  ;;  %v1994_v25 = vsel %vm1939_vm1, %v1103_v55, %v1838_v59 }
 0x171   : > { %v2289_v5 = vcombine.low %v1992_v15, %v1993_v40  ;;  %v1995_v50 = vsel %vm1939_vm1, %v1105_v41, %v1842_v38 }
 0x172   : > { %v2280_v21 = vrot.slane %v2272_v8, %v3133_v14  ;;  %v2287_v10 = vrot.slane %v2273_v62, %v3133_v14  ;;  %v2290_v39 = vcombine.low %v1994_v25, %v1995_v50 }
 0x173   : > { %v2297_v37 = vrot.slane %v2289_v5, %v3133_v14 }
 0x174   : > { %v2288_v60 = vcombine.low %v2280_v21, %v2287_v10  ;;  %v2304_v0 = vrot.slane %v2290_v39, %v3133_v14 }
 0x176   : > { %v2305_v16 = vcombine.low %v2297_v37, %v2304_v0  ;;  %2369 = vst.msk [vmem:[%s3327_s19 + $0x60] sm:$0xff] %vm2356_vm2, %v2288_v60 }
 0x178   : > { %2370 = vst.msk [vmem:[%s3327_s19 + $0x68] sm:$0xff] %vm2356_vm2, %v2305_v16 }
 0x179   : > { %2812 = shalt.err (!%p2809_p5)
}
 0x17a   : > { %s2813_s3 = scalar_lea.hbm %s3653_s26, 2048  ;;  %s2817_s27 = scalar_lea.hbm %s3709_s2, 4096 }
 0x17b   : > { %p2814_p7 = scmp.ne.s32.totalorder %s3653_s26, %s2813_s3  ;;  %p2818_p9 = scmp.lt.s32.totalorder %s3653_s26, %s3709_s2 }
 0x17c   : > { %p2819_p11 = scmp.lt.s32.totalorder %s2817_s27, %s2813_s3 }
 0x17d   : > { %p2815_p4 = pnand %p2814_p7, %p2999_p13 }
 0x17e   : > { %p2820_p10 = por %p2819_p11, %p2818_p9 }
 0x17f   : > { %p2816_p6 = pneg %p2815_p4 }
 0x181   : > { %p2821_p1 = pnand %p2820_p10, %p2816_p6 }
 0x183   : > { %2824 = shalt.err (!%p2821_p1)
}
 0x184   : > { %s2892_s17 = smov 128   ;;  %s2893_s19 = smov 8  }
 0x185   : > { %2672 = dma.vmem_to_hbm [thread:$0]  (%p2999_p13), %s3655_s28, 2048, %s3653_s26, %s2374_s12, %s2892_s17, %s2892_s17, %s2893_s19  }
 0x186 PF: > { %s2405_s21 = sand.u32 1, %s2863_s9   ;;  %p3739_p8 = scmp.ne.s32.totalorder %s3715_s20, 0 }
 0x187   : > { %p3740_p12 = scmp.ge.s32.totalorder %s2883_s14, 2  ;;  %s2406_s23 = scalar_lea.sflag [#allocation4], %s2405_s21 }
 0x189   : > { %p2683_p0 = pnand %p3740_p12, %p3739_p8 }
 0x18b   : > { %p2684_p2 = pneg %p2683_p0 }
 0x18d   : > { %2858 = dma.done.wait (%p2684_p2), %s2406_s23, 2048  }
 0x18e   : > { %2860 = vsyncadd (%p2684_p2), %s2406_s23, 4294965248  ;;  %s19_s14 = sadd.s32 1, %s2883_s14   ;;  %s3741_s9 = smov %s2867_s10 }
 0x18f   : > { %p16_p3 = scmp.ge.s32.totalorder %s19_s14, 4   ;;  %s3742_s10 = smov %s2871_s11 }
 0x190   : > { %s3743_s11 = smov %s3008_s15  ;;  %s3744_s12 = smov %s2879_s13 }
 0x191   : > { %s3745_s13 = smov %s3747_s25  ;;  %18 = sbr.rel (!%p16_p3) target bundleno = 7 (0x7), region = 81 }
 0x196   :  { %2411 = vsyncpa [#allocation3], 1 }
 0x197   :  { %2413 = vsyncpa [#allocation3 + $0x1], 1 }
 0x198   :  { %2414 = vsyncpa [#allocation6], 1 }
 0x199   :  { %2415 = vsyncpa [#allocation4], 1 }
 0x19a   :  { %2417 = vsyncpa [#allocation4 + $0x1], 1 }

</bundles_post_ra>
